<compile_context>
chip_gen: v6e
topology: v6e:2x2x1
jax: 0.10.0
libtpu: 0.0.40
codegen_flags: <defaults>
</compile_context>

<pallas_src>
import jax
import jax.numpy as jnp
from jax.experimental import pallas as pl
from jax.experimental.pallas import tpu as pltpu


# ----------------------------------------------------------------------------
# Fused kernel: out = CBR_2x(CBR(x)),  CBR = ReLU(conv3x3_scaled(x) + shift)
# One grid step == one batch element. All intermediates stay in VMEM.
# ----------------------------------------------------------------------------
def _make_kernel(H, W, C):
    WC = W * C

    def kernel(x_ref, a_ref, sh_ref, out_ref, pad_sc):
        # x_ref  : (1, H, W*C)      lane-dense NHWC slab for this batch element
        # a_ref  : (3, W*C, W*C)    Toeplitz-packed 3x3 weights (BN scale folded)
        # sh_ref : (1, W*C)         folded BN shift + conv bias (tiled over W)
        # out_ref: (1, H, W*C)
        # pad_sc : VMEM (H+2, W*C)  vertically zero-padded activation slab

        def conv_bn_relu(in_gain):
            # 3x3 conv == 3 row-shifted (H, WC) @ (WC, WC) MXU matmuls.
            acc = jnp.dot(pad_sc[0:H, :], a_ref[0],
                          preferred_element_type=jnp.float32)
            acc = acc + jnp.dot(pad_sc[1:1 + H, :], a_ref[1],
                                preferred_element_type=jnp.float32)
            acc = acc + jnp.dot(pad_sc[2:2 + H, :], a_ref[2],
                                preferred_element_type=jnp.float32)
            # conv(g * x) == g * conv(x)  (linearity of the matmul part)
            return jnp.maximum(acc * in_gain + sh_ref[...], 0.0)

        # Vertical zero padding rows (top / bottom); interior is always
        # overwritten below, so only these two rows need initialization.
        zero_row = jnp.zeros((1, WC), jnp.float32)
        pad_sc[0:1, :] = zero_row
        pad_sc[H + 1:H + 2, :] = zero_row

        pad_sc[1:1 + H, :] = x_ref[0]
        h = conv_bn_relu(1.0)               # i == 0 : x = conv(x)
        pad_sc[1:1 + H, :] = h
        out_ref[0] = conv_bn_relu(2.0)      # out = conv(x + x)

    return kernel


# ----------------------------------------------------------------------------
# Wrapper: parameter folding / packing, NCHW<->NHWC glue, pallas_call plumbing.
# ----------------------------------------------------------------------------
def _pack_toeplitz(w_hwio, W):
    """Pack (3,3,Cin,Cout) HWIO weights into 3 banded (W*Cin, W*Cout) matrices.

    A[kh, wi*Cin + ci, wo*Cout + co] = w[kh, wi + 1 - wo, ci, co]
                                       if 0 <= wi + 1 - wo <= 2 else 0
    (horizontal SAME padding handled by the band mask; vertical padding by the
    two zero rows in the kernel's scratch slab).  Built with gather + mask
    only, so it is exact.
    """
    KH, KW, Cin, Cout = w_hwio.shape
    wi = jnp.arange(W)[:, None]                       # input column  (W, 1)
    wo = jnp.arange(W)[None, :]                       # output column (1, W)
    kw_idx = wi + 1 - wo                              # (W, W)
    valid = (kw_idx >= 0) & (kw_idx < KW)
    a5 = jnp.take(w_hwio, jnp.clip(kw_idx, 0, KW - 1), axis=1)  # (KH,W,W,Ci,Co)
    a5 = jnp.where(valid[None, :, :, None, None], a5, 0.0)
    a5 = jnp.transpose(a5, (0, 1, 3, 2, 4))           # (KH, W_in, Ci, W_out, Co)
    return a5.reshape(KH, W * Cin, W * Cout)


def recurrent_block_forward(x_nchw, params, t=2, eps=1e-5):
    """x_nchw: (N, C, H, W) float32 -> (N, C, H, W) float32."""
    assert t >= 1  # result is independent of t for t >= 1 (see header comment)
    x = jnp.transpose(x_nchw, (0, 2, 3, 1)).astype(jnp.float32)   # -> NHWC
    N, H, W, C = x.shape
    WC = W * C

    # Fold eval-mode BN and the conv bias:
    #   ReLU(((conv(x)+b) - m)/sqrt(v+eps)*g + beta) = ReLU(conv(x)*sc + sh)
    scale = params["bn_g"] / jnp.sqrt(params["bn_v"] + eps)
    shift = params["bn_b"] + (params["b"] - params["bn_m"]) * scale

    a = _pack_toeplitz(params["w"].astype(jnp.float32), W)        # (3, WC, WC)
    a = a * jnp.tile(scale, W)[None, None, :]                     # fold BN scale
    sh = jnp.tile(shift, W).reshape(1, WC)

    x_slab = x.reshape(N, H, WC)                       # lane-dense activation

    out_slab = pl.pallas_call(
        _make_kernel(H, W, C),
        grid=(N,),
        in_specs=[
            pl.BlockSpec((1, H, WC), lambda n: (n, 0, 0)),
            pl.BlockSpec((3, WC, WC), lambda n: (0, 0, 0)),
            pl.BlockSpec((1, WC), lambda n: (0, 0)),
        ],
        out_specs=pl.BlockSpec((1, H, WC), lambda n: (n, 0, 0)),
        out_shape=jax.ShapeDtypeStruct((N, H, WC), jnp.float32),
        scratch_shapes=[pltpu.VMEM((H + 2, WC), jnp.float32)],
        compiler_params=pltpu.CompilerParams(
            dimension_semantics=("parallel",)),
    )(x_slab, a, sh)

    out = out_slab.reshape(N, H, W, C)
    return jnp.transpose(out, (0, 3, 1, 2))            # -> NCHW


# ----------------------------------------------------------------------------
# Pure-JAX reference mirroring the PyTorch forward loop (lax.conv based).
# ----------------------------------------------------------------------------
def _reference(x_nchw, params, t=2, eps=1e-5):
    x = jnp.transpose(x_nchw, (0, 2, 3, 1))
    dn = ("NHWC", "HWIO", "NHWC")

    def conv_bn_relu(inp):
        y = jax.lax.conv_general_dilated(inp, params["w"], (1, 1), "SAME",
                                         dimension_numbers=dn)
        y = y + params["b"].reshape(1, 1, 1, -1)
        y = (y - params["bn_m"]) / jnp.sqrt(params["bn_v"] + eps) \
            * params["bn_g"] + params["bn_b"]
        return jnp.maximum(y, 0.0)

    out = None
    for i in range(t):
        if i == 0:
            x = conv_bn_relu(x)
        out = conv_bn_relu(x + x)
    return jnp.transpose(out, (0, 3, 1, 2))


def _make_params(key, ch):
    ks = jax.random.split(key, 6)
    return {
        # conv weight stored directly in HWIO layout (synthetic init)
        "w": jax.random.normal(ks[0], (3, 3, ch, ch), jnp.float32) * 0.1,
        "b": jax.random.normal(ks[1], (ch,), jnp.float32) * 0.1,
        "bn_g": 1.0 + 0.1 * jax.random.normal(ks[2], (ch,), jnp.float32),
        "bn_b": 0.1 * jax.random.normal(ks[3], (ch,), jnp.float32),
        "bn_m": 0.1 * jax.random.normal(ks[4], (ch,), jnp.float32),
        "bn_v": 1.0 + 0.1 * jnp.abs(jax.random.normal(ks[5], (ch,), jnp.float32)),
    }


if __name__ == "__main__":
    key = jax.random.PRNGKey(0)
    k_x, k_p = jax.random.split(key)

    # Recurrent_block requires in_ch == out_ch; W * C = 16 * 8 = 128 lanes.
    N, CH, H, W = 2, 8, 16, 16
    x = jax.random.normal(k_x, (N, CH, H, W), jnp.float32)
    params = _make_params(k_p, CH)

    out = jax.jit(recurrent_block_forward)(x, params)
    out = jax.block_until_ready(out)

    ref = _reference(x, params, t=2)
    assert out.shape == (N, CH, H, W)
    max_err = float(jnp.max(jnp.abs(out - ref)))
    assert max_err < 2e-3, f"max abs error {max_err}"

    print("KERNEL_OK")
</pallas_src>

<mosaic_0001>
module attributes {stable_mosaic.version = 11 : i64} {
  func.func @kernel(%arg0: i32, %arg1: memref<1x16x128xf32, #tpu.memory_space<vmem>>, %arg2: memref<3x128x128xf32, #tpu.memory_space<vmem>>, %arg3: memref<1x128xf32, #tpu.memory_space<vmem>>, %arg4: memref<1x16x128xf32, #tpu.memory_space<vmem>>, %arg5: memref<18x128xf32, #tpu.memory_space<vmem>>) attributes {dimension_semantics = [#tpu.dimension_semantics<parallel>], iteration_bounds = array<i64: 2>, scalar_prefetch = 0 : i64, scratch_operands = 1 : i64, tpu.core_type = #tpu.core_type<tc>, window_params = [{transform_indices = @transform_0, window_bounds = array<i64: 1, 16, 128>}, {pipeline_mode = #tpu.pipeline_mode<synchronous>, transform_indices = @transform_1, window_bounds = array<i64: 3, 128, 128>}, {pipeline_mode = #tpu.pipeline_mode<synchronous>, transform_indices = @transform_2, window_bounds = array<i64: 1, 128>}, {transform_indices = @transform_3, window_bounds = array<i64: 1, 16, 128>}]} {
    %cst = arith.constant 0.000000e+00 : f32
    %0 = vector.broadcast %cst : f32 to vector<1x128xf32>
    %c0 = arith.constant 0 : index
    %c0_0 = arith.constant 0 : index
    %1 = vector.load %arg5[%c0, %c0_0] : memref<18x128xf32, #tpu.memory_space<vmem>>, vector<1x128xf32>
    tpu.vector_store %arg5[%c0, %c0_0], %0 {strides = array<i32>} : memref<18x128xf32, #tpu.memory_space<vmem>>, vector<1x128xf32>,
    %c17 = arith.constant 17 : index
    %c0_1 = arith.constant 0 : index
    %2 = vector.load %arg5[%c17, %c0_1] : memref<18x128xf32, #tpu.memory_space<vmem>>, vector<1x128xf32>
    tpu.vector_store %arg5[%c17, %c0_1], %0 {strides = array<i32>} : memref<18x128xf32, #tpu.memory_space<vmem>>, vector<1x128xf32>,
    %c0_2 = arith.constant 0 : index
    %c0_3 = arith.constant 0 : index
    %c0_4 = arith.constant 0 : index
    %3 = vector.load %arg1[%c0_2, %c0_3, %c0_4] : memref<1x16x128xf32, #tpu.memory_space<vmem>>, vector<1x16x128xf32>
    %4 = vector.shape_cast %3 : vector<1x16x128xf32> to vector<16x128xf32>
    %c1 = arith.constant 1 : index
    %c0_5 = arith.constant 0 : index
    %5 = vector.load %arg5[%c1, %c0_5] : memref<18x128xf32, #tpu.memory_space<vmem>>, vector<16x128xf32>
    tpu.vector_store %arg5[%c1, %c0_5], %4 {strides = array<i32>} : memref<18x128xf32, #tpu.memory_space<vmem>>, vector<16x128xf32>,
    %c0_6 = arith.constant 0 : index
    %c0_7 = arith.constant 0 : index
    %6 = vector.load %arg5[%c0_6, %c0_7] : memref<18x128xf32, #tpu.memory_space<vmem>>, vector<16x128xf32>
    %c0_8 = arith.constant 0 : index
    %c0_9 = arith.constant 0 : index
    %c0_10 = arith.constant 0 : index
    %7 = vector.load %arg2[%c0_8, %c0_9, %c0_10] : memref<3x128x128xf32, #tpu.memory_space<vmem>>, vector<1x128x128xf32>
    %8 = vector.shape_cast %7 : vector<1x128x128xf32> to vector<128x128xf32>
    %cst_11 = arith.constant dense<0.000000e+00> : vector<16x128xf32>
    %9 = tpu.matmul %6, %8, %cst_11 {dimension_numbers = #tpu.dot_dimension_numbers<[1], [0], [0], [1], [0, 0, 1, 1], [], []>} : vector<16x128xf32>, vector<128x128xf32>, vector<16x128xf32> -> vector<16x128xf32>
    %c1_12 = arith.constant 1 : index
    %c0_13 = arith.constant 0 : index
    %10 = vector.load %arg5[%c1_12, %c0_13] : memref<18x128xf32, #tpu.memory_space<vmem>>, vector<16x128xf32>
    %c1_14 = arith.constant 1 : index
    %c0_15 = arith.constant 0 : index
    %c0_16 = arith.constant 0 : index
    %11 = vector.load %arg2[%c1_14, %c0_15, %c0_16] : memref<3x128x128xf32, #tpu.memory_space<vmem>>, vector<1x128x128xf32>
    %12 = vector.shape_cast %11 : vector<1x128x128xf32> to vector<128x128xf32>
    %cst_17 = arith.constant dense<0.000000e+00> : vector<16x128xf32>
    %13 = tpu.matmul %10, %12, %cst_17 {dimension_numbers = #tpu.dot_dimension_numbers<[1], [0], [0], [1], [0, 0, 1, 1], [], []>} : vector<16x128xf32>, vector<128x128xf32>, vector<16x128xf32> -> vector<16x128xf32>
    %14 = arith.addf %9, %13 : vector<16x128xf32>
    %c2 = arith.constant 2 : index
    %c0_18 = arith.constant 0 : index
    %15 = vector.load %arg5[%c2, %c0_18] : memref<18x128xf32, #tpu.memory_space<vmem>>, vector<16x128xf32>
    %c2_19 = arith.constant 2 : index
    %c0_20 = arith.constant 0 : index
    %c0_21 = arith.constant 0 : index
    %16 = vector.load %arg2[%c2_19, %c0_20, %c0_21] : memref<3x128x128xf32, #tpu.memory_space<vmem>>, vector<1x128x128xf32>
    %17 = vector.shape_cast %16 : vector<1x128x128xf32> to vector<128x128xf32>
    %cst_22 = arith.constant dense<0.000000e+00> : vector<16x128xf32>
    %18 = tpu.matmul %15, %17, %cst_22 {dimension_numbers = #tpu.dot_dimension_numbers<[1], [0], [0], [1], [0, 0, 1, 1], [], []>} : vector<16x128xf32>, vector<128x128xf32>, vector<16x128xf32> -> vector<16x128xf32>
    %19 = arith.addf %14, %18 : vector<16x128xf32>
    %cst_23 = arith.constant 1.000000e+00 : f32
    %20 = vector.broadcast %cst_23 : f32 to vector<16x128xf32>
    %21 = arith.mulf %19, %20 : vector<16x128xf32>
    %c0_24 = arith.constant 0 : index
    %c0_25 = arith.constant 0 : index
    %22 = vector.load %arg3[%c0_24, %c0_25] : memref<1x128xf32, #tpu.memory_space<vmem>>, vector<1x128xf32>
    %23 = vector.broadcast %22 : vector<1x128xf32> to vector<16x128xf32>
    %24 = arith.addf %21, %23 : vector<16x128xf32>
    %cst_26 = arith.constant 0.000000e+00 : f32
    %25 = vector.broadcast %cst_26 : f32 to vector<16x128xf32>
    %26 = arith.maximumf %24, %25 : vector<16x128xf32>
    %c1_27 = arith.constant 1 : index
    %c0_28 = arith.constant 0 : index
    %27 = vector.load %arg5[%c1_27, %c0_28] : memref<18x128xf32, #tpu.memory_space<vmem>>, vector<16x128xf32>
    tpu.vector_store %arg5[%c1_27, %c0_28], %26 {strides = array<i32>} : memref<18x128xf32, #tpu.memory_space<vmem>>, vector<16x128xf32>,
    %c0_29 = arith.constant 0 : index
    %c0_30 = arith.constant 0 : index
    %28 = vector.load %arg5[%c0_29, %c0_30] : memref<18x128xf32, #tpu.memory_space<vmem>>, vector<16x128xf32>
    %c0_31 = arith.constant 0 : index
    %c0_32 = arith.constant 0 : index
    %c0_33 = arith.constant 0 : index
    %29 = vector.load %arg2[%c0_31, %c0_32, %c0_33] : memref<3x128x128xf32, #tpu.memory_space<vmem>>, vector<1x128x128xf32>
    %30 = vector.shape_cast %29 : vector<1x128x128xf32> to vector<128x128xf32>
    %cst_34 = arith.constant dense<0.000000e+00> : vector<16x128xf32>
    %31 = tpu.matmul %28, %30, %cst_34 {dimension_numbers = #tpu.dot_dimension_numbers<[1], [0], [0], [1], [0, 0, 1, 1], [], []>} : vector<16x128xf32>, vector<128x128xf32>, vector<16x128xf32> -> vector<16x128xf32>
    %c1_35 = arith.constant 1 : index
    %c0_36 = arith.constant 0 : index
    %32 = vector.load %arg5[%c1_35, %c0_36] : memref<18x128xf32, #tpu.memory_space<vmem>>, vector<16x128xf32>
    %c1_37 = arith.constant 1 : index
    %c0_38 = arith.constant 0 : index
    %c0_39 = arith.constant 0 : index
    %33 = vector.load %arg2[%c1_37, %c0_38, %c0_39] : memref<3x128x128xf32, #tpu.memory_space<vmem>>, vector<1x128x128xf32>
    %34 = vector.shape_cast %33 : vector<1x128x128xf32> to vector<128x128xf32>
    %cst_40 = arith.constant dense<0.000000e+00> : vector<16x128xf32>
    %35 = tpu.matmul %32, %34, %cst_40 {dimension_numbers = #tpu.dot_dimension_numbers<[1], [0], [0], [1], [0, 0, 1, 1], [], []>} : vector<16x128xf32>, vector<128x128xf32>, vector<16x128xf32> -> vector<16x128xf32>
    %36 = arith.addf %31, %35 : vector<16x128xf32>
    %c2_41 = arith.constant 2 : index
    %c0_42 = arith.constant 0 : index
    %37 = vector.load %arg5[%c2_41, %c0_42] : memref<18x128xf32, #tpu.memory_space<vmem>>, vector<16x128xf32>
    %c2_43 = arith.constant 2 : index
    %c0_44 = arith.constant 0 : index
    %c0_45 = arith.constant 0 : index
    %38 = vector.load %arg2[%c2_43, %c0_44, %c0_45] : memref<3x128x128xf32, #tpu.memory_space<vmem>>, vector<1x128x128xf32>
    %39 = vector.shape_cast %38 : vector<1x128x128xf32> to vector<128x128xf32>
    %cst_46 = arith.constant dense<0.000000e+00> : vector<16x128xf32>
    %40 = tpu.matmul %37, %39, %cst_46 {dimension_numbers = #tpu.dot_dimension_numbers<[1], [0], [0], [1], [0, 0, 1, 1], [], []>} : vector<16x128xf32>, vector<128x128xf32>, vector<16x128xf32> -> vector<16x128xf32>
    %41 = arith.addf %36, %40 : vector<16x128xf32>
    %cst_47 = arith.constant 2.000000e+00 : f32
    %42 = vector.broadcast %cst_47 : f32 to vector<16x128xf32>
    %43 = arith.mulf %41, %42 : vector<16x128xf32>
    %c0_48 = arith.constant 0 : index
    %c0_49 = arith.constant 0 : index
    %44 = vector.load %arg3[%c0_48, %c0_49] : memref<1x128xf32, #tpu.memory_space<vmem>>, vector<1x128xf32>
    %45 = vector.broadcast %44 : vector<1x128xf32> to vector<16x128xf32>
    %46 = arith.addf %43, %45 : vector<16x128xf32>
    %cst_50 = arith.constant 0.000000e+00 : f32
    %47 = vector.broadcast %cst_50 : f32 to vector<16x128xf32>
    %48 = arith.maximumf %46, %47 : vector<16x128xf32>
    %c0_51 = arith.constant 0 : index
    %c0_52 = arith.constant 0 : index
    %c0_53 = arith.constant 0 : index
    %49 = vector.load %arg4[%c0_51, %c0_52, %c0_53] : memref<1x16x128xf32, #tpu.memory_space<vmem>>, vector<1x16x128xf32>
    %50 = vector.shape_cast %49 : vector<1x16x128xf32> to vector<16x128xf32>
    %51 = vector.shape_cast %48 : vector<16x128xf32> to vector<1x16x128xf32>
    tpu.vector_store %arg4[%c0_51, %c0_52, %c0_53], %51 {strides = array<i32>} : memref<1x16x128xf32, #tpu.memory_space<vmem>>, vector<1x16x128xf32>,
    return
  }
  func.func @transform_0(%arg0: i32) -> (i32, i32, i32) {
    %c0_i32 = arith.constant 0 : i32
    %c0_i32_0 = arith.constant 0 : i32
    %c0_i32_1 = arith.constant 0 : i32
    return %arg0, %c0_i32, %c0_i32_0 : i32, i32, i32
  }
  func.func @transform_1(%arg0: i32) -> (i32, i32, i32) {
    %c0_i32 = arith.constant 0 : i32
    %c0_i32_0 = arith.constant 0 : i32
    %c0_i32_1 = arith.constant 0 : i32
    %c0_i32_2 = arith.constant 0 : i32
    return %c0_i32, %c0_i32_0, %c0_i32_1 : i32, i32, i32
  }
  func.func @transform_2(%arg0: i32) -> (i32, i32) {
    %c0_i32 = arith.constant 0 : i32
    %c0_i32_0 = arith.constant 0 : i32
    %c0_i32_1 = arith.constant 0 : i32
    return %c0_i32, %c0_i32_0 : i32, i32
  }
  func.func @transform_3(%arg0: i32) -> (i32, i32, i32) {
    %c0_i32 = arith.constant 0 : i32
    %c0_i32_0 = arith.constant 0 : i32
    %c0_i32_1 = arith.constant 0 : i32
    return %arg0, %c0_i32, %c0_i32_0 : i32, i32, i32
  }
}

</mosaic_0001>

<bundles_post_ra>
// kernel: tile.13
= control target key start
LH: loop header
LB: loop body
LE: loop exit
PB: predicated region body
PF: predicated region fallthrough
CT: control target
= control target key end

     0   :  { %s28_s0 = inlined_call_operand.vmem [shape: f32[8], index: 0, kind: input, shape index: {}]   ;;  %s29_s1 = inlined_call_operand.vmem [shape: f32[16,8], index: 1, kind: output, shape index: {}]  }
   0x1   :  { %v4_v0 = vld [vmem:[%s28_s0] ss:$0 sm:$0xff] }
   0x2   :  { %5 = vst [vmem:[%s29_s1] sm:$0xff] %v4_v0  ;;  %8 = vst [vmem:[%s29_s1 + $0x8] sm:$0xff] %v4_v0 }

// kernel: mul.7
= control target key start
LH: loop header
LB: loop body
LE: loop exit
PB: predicated region body
PF: predicated region fallthrough
CT: control target
= control target key end

     0   :  { %s133_s10 = smov 120   ;;  %s134_s11 = smov 104   ;;  %vm3_vm0 = vcmask 64512   ;;  %vm9_vm1 = vcmask 1048512   ;;  %vm15_vm2 = vcmask 982912   ;;  %vm21_vm3 = vcmask 917312   ;;  %s209_s0 = inlined_call_operand.vmem [shape: f32[16,8], index: 0, kind: input, shape index: {}]   ;;  %s210_s1 = inlined_call_operand.vmem [shape: f32[128], index: 1, kind: output, shape index: {}]  }
   0x1   :  { %v103_v0 = vld [vmem:[%s209_s0 + $0xf] sm:$0x1]   ;;  %v105_v1 = vld [vmem:[%s209_s0 + $0xd] sm:$0x1]   ;;  %v104_v2 = vld [vmem:[%s209_s0 + $0xe] sm:$0x1]  }
   0x2   :  { %7 = vrot.lane.b32.xlu0 %v103_v0, %s133_s10  ;;  %19 = vrot.lane.b32.xlu1 %v105_v1, %s134_s11  ;;  %v106_v3 = vld [vmem:[%s209_s0 + $0xc] sm:$0x1]   ;;  %s135_s16 = smov 112   ;;  %s136_s17 = smov 96   ;;  %v107_v4 = vld [vmem:[%s209_s0 + $0xb] sm:$0x1]  }
   0x3   :  { %v108_v5 = vld [vmem:[%s209_s0 + $0xa] sm:$0x1]   ;;  %v2_v6 = vld [vmem:[%s209_s0] sm:$0x1]   ;;  %s137_s24 = smov 88   ;;  %s138_s25 = smov 80  }
   0x4   :  { %4 = vst.msk [vmem:[#allocation0] sm:$0x1] %vm3_vm0, %v2_v6   ;;  %v109_v7 = vld [vmem:[%s209_s0 + $0x9] sm:$0x1]   ;;  %v110_v8 = vld [vmem:[%s209_s0 + $0x8] sm:$0x1]  }
   0x5   :  { %s139_s30 = smov 72   ;;  %s140_s2 = smov 64   ;;  %v111_v9 = vld [vmem:[%s209_s0 + $0x7] sm:$0x1]   ;;  %v112_v10 = vld [vmem:[%s209_s0 + $0x6] sm:$0x1]  }
   0x6   :  { %13 = vrot.lane.b32.xlu0 %v104_v2, %s135_s16  ;;  %25 = vrot.lane.b32.xlu1 %v106_v3, %s136_s17  ;;  %s141_s7 = smov 56   ;;  %s142_s8 = smov 48   ;;  %v113_v11 = vld [vmem:[%s209_s0 + $0x5] sm:$0x1]   ;;  %v114_v12 = vld [vmem:[%s209_s0 + $0x4] sm:$0x1]  }
   0x7   :  { %s143_s13 = smov 40   ;;  %s144_s14 = smov 32   ;;  %v115_v13 = vld [vmem:[%s209_s0 + $0x3] sm:$0x1]   ;;  %v116_v14 = vld [vmem:[%s209_s0 + $0x2] sm:$0x1]  }
   0x8   :  { %s145_s19 = smov 24   ;;  %s146_s20 = smov 16   ;;  %v117_v15 = vld [vmem:[%s209_s0 + $0x1] sm:$0x1]   ;;  %vm27_vm4 = vcmask 851712   ;;  %vm33_vm5 = vcmask 786112  }
   0x9   :  { %s147_s0 = smov 8   ;;  %vm39_vm6 = vcmask 720512   ;;  %vm45_vm7 = vcmask 654912   ;;  %vm51_vm8 = vcmask 589312   ;;  %vm57_vm9 = vcmask 523712  }
   0xa   :  { %31 = vrot.lane.b32.xlu0 %v107_v4, %s137_s24  ;;  %37 = vrot.lane.b32.xlu1 %v108_v5, %s138_s25  ;;  %vm63_vm10 = vcmask 458112   ;;  %vm69_vm11 = vcmask 392512   ;;  %vm75_vm12 = vcmask 326912   ;;  %vm81_vm13 = vcmask 261312  }
   0xb   :  { %vm87_vm14 = vcmask 195712   ;;  %vm93_vm15 = vcmask 130112  }
   0xe   :  { %43 = vrot.lane.b32.xlu0 %v109_v7, %s139_s30  ;;  %49 = vrot.lane.b32.xlu1 %v110_v8, %s140_s2 }
  0x12   :  { %55 = vrot.lane.b32.xlu0 %v111_v9, %s141_s7  ;;  %61 = vrot.lane.b32.xlu1 %v112_v10, %s142_s8 }
  0x16   :  { %67 = vrot.lane.b32.xlu0 %v113_v11, %s143_s13  ;;  %73 = vrot.lane.b32.xlu1 %v114_v12, %s144_s14 }
  0x1a   :  { %79 = vrot.lane.b32.xlu0 %v115_v13, %s145_s19  ;;  %85 = vrot.lane.b32.xlu1 %v116_v14, %s146_s20 }
  0x1e   :  { %91 = vrot.lane.b32.xlu0 %v117_v15, %s147_s0 }
  0x74   :  { %v8_v16 = vpop.permute.xlu0 %7   ;;  %v20_v17 = vpop.permute.xlu1 %19  }
  0x75   :  { %10 = vst.msk [vmem:[#allocation0] sm:$0x1] %vm9_vm1, %v8_v16  }
  0x78   :  { %v14_v18 = vpop.permute.xlu0 %13   ;;  %v26_v19 = vpop.permute.xlu1 %25  }
  0x79   :  { %16 = vst.msk [vmem:[#allocation0] sm:$0x1] %vm15_vm2, %v14_v18  }
  0x7a   :  { %22 = vst.msk [vmem:[#allocation0] sm:$0x1] %vm21_vm3, %v20_v17  }
  0x7b   :  { %28 = vst.msk [vmem:[#allocation0] sm:$0x1] %vm27_vm4, %v26_v19  }
  0x7c   :  { %v32_v20 = vpop.permute.xlu0 %31   ;;  %v38_v21 = vpop.permute.xlu1 %37  }
  0x7d   :  { %34 = vst.msk [vmem:[#allocation0] sm:$0x1] %vm33_vm5, %v32_v20  }
  0x7e   :  { %40 = vst.msk [vmem:[#allocation0] sm:$0x1] %vm39_vm6, %v38_v21  }
  0x80   :  { %v44_v22 = vpop.permute.xlu0 %43   ;;  %v50_v23 = vpop.permute.xlu1 %49  }
  0x81   :  { %46 = vst.msk [vmem:[#allocation0] sm:$0x1] %vm45_vm7, %v44_v22  }
  0x82   :  { %52 = vst.msk [vmem:[#allocation0] sm:$0x1] %vm51_vm8, %v50_v23  }
  0x84   :  { %v56_v24 = vpop.permute.xlu0 %55   ;;  %v62_v25 = vpop.permute.xlu1 %61  }
  0x85   :  { %58 = vst.msk [vmem:[#allocation0] sm:$0x1] %vm57_vm9, %v56_v24  }
  0x86   :  { %64 = vst.msk [vmem:[#allocation0] sm:$0x1] %vm63_vm10, %v62_v25  }
  0x88   :  { %v68_v26 = vpop.permute.xlu0 %67   ;;  %v74_v27 = vpop.permute.xlu1 %73  }
  0x89   :  { %70 = vst.msk [vmem:[#allocation0] sm:$0x1] %vm69_vm11, %v68_v26  }
  0x8a   :  { %76 = vst.msk [vmem:[#allocation0] sm:$0x1] %vm75_vm12, %v74_v27  }
  0x8c   :  { %v80_v28 = vpop.permute.xlu0 %79   ;;  %v86_v29 = vpop.permute.xlu1 %85  }
  0x8d   :  { %82 = vst.msk [vmem:[#allocation0] sm:$0x1] %vm81_vm13, %v80_v28  }
  0x8e   :  { %88 = vst.msk [vmem:[#allocation0] sm:$0x1] %vm87_vm14, %v86_v29  }
  0x90   :  { %v92_v30 = vpop.permute.xlu0 %91  }
  0x91   :  { %94 = vst.msk [vmem:[#allocation0] sm:$0x1] %vm93_vm15, %v92_v30  }
  0x98   :  { %v99_v31 = vld [vmem:[#allocation0] sm:$0x1] }
  0x99   :  { %102 = vst [vmem:[%s210_s1] sm:$0x1] %v99_v31 }

// kernel: tile.19
= control target key start
LH: loop header
LB: loop body
LE: loop exit
PB: predicated region body
PF: predicated region fallthrough
CT: control target
= control target key end

     0   :  { %s133_s10 = smov 120   ;;  %s134_s11 = smov 104   ;;  %vm3_vm0 = vcmask 64512   ;;  %vm9_vm1 = vcmask 1048512   ;;  %vm15_vm2 = vcmask 982912   ;;  %vm21_vm3 = vcmask 917312   ;;  %s209_s0 = inlined_call_operand.vmem [shape: f32[16,8], index: 0, kind: input, shape index: {}]   ;;  %s210_s1 = inlined_call_operand.vmem [shape: f32[1,128], index: 1, kind: output, shape index: {}]  }
   0x1   :  { %v103_v0 = vld [vmem:[%s209_s0 + $0xf] sm:$0x1]   ;;  %v105_v1 = vld [vmem:[%s209_s0 + $0xd] sm:$0x1]   ;;  %v104_v2 = vld [vmem:[%s209_s0 + $0xe] sm:$0x1]  }
   0x2   :  { %7 = vrot.lane.b32.xlu0 %v103_v0, %s133_s10  ;;  %19 = vrot.lane.b32.xlu1 %v105_v1, %s134_s11  ;;  %v106_v3 = vld [vmem:[%s209_s0 + $0xc] sm:$0x1]   ;;  %s135_s16 = smov 112   ;;  %s136_s17 = smov 96   ;;  %v107_v4 = vld [vmem:[%s209_s0 + $0xb] sm:$0x1]  }
   0x3   :  { %v108_v5 = vld [vmem:[%s209_s0 + $0xa] sm:$0x1]   ;;  %v2_v6 = vld [vmem:[%s209_s0] sm:$0x1]   ;;  %s137_s24 = smov 88   ;;  %s138_s25 = smov 80  }
   0x4   :  { %4 = vst.msk [vmem:[#allocation0] sm:$0x1] %vm3_vm0, %v2_v6   ;;  %v109_v7 = vld [vmem:[%s209_s0 + $0x9] sm:$0x1]   ;;  %v110_v8 = vld [vmem:[%s209_s0 + $0x8] sm:$0x1]  }
   0x5   :  { %s139_s30 = smov 72   ;;  %s140_s2 = smov 64   ;;  %v111_v9 = vld [vmem:[%s209_s0 + $0x7] sm:$0x1]   ;;  %v112_v10 = vld [vmem:[%s209_s0 + $0x6] sm:$0x1]  }
   0x6   :  { %13 = vrot.lane.b32.xlu0 %v104_v2, %s135_s16  ;;  %25 = vrot.lane.b32.xlu1 %v106_v3, %s136_s17  ;;  %s141_s7 = smov 56   ;;  %s142_s8 = smov 48   ;;  %v113_v11 = vld [vmem:[%s209_s0 + $0x5] sm:$0x1]   ;;  %v114_v12 = vld [vmem:[%s209_s0 + $0x4] sm:$0x1]  }
   0x7   :  { %s143_s13 = smov 40   ;;  %s144_s14 = smov 32   ;;  %v115_v13 = vld [vmem:[%s209_s0 + $0x3] sm:$0x1]   ;;  %v116_v14 = vld [vmem:[%s209_s0 + $0x2] sm:$0x1]  }
   0x8   :  { %s145_s19 = smov 24   ;;  %s146_s20 = smov 16   ;;  %v117_v15 = vld [vmem:[%s209_s0 + $0x1] sm:$0x1]   ;;  %vm27_vm4 = vcmask 851712   ;;  %vm33_vm5 = vcmask 786112  }
   0x9   :  { %s147_s0 = smov 8   ;;  %vm39_vm6 = vcmask 720512   ;;  %vm45_vm7 = vcmask 654912   ;;  %vm51_vm8 = vcmask 589312   ;;  %vm57_vm9 = vcmask 523712  }
   0xa   :  { %31 = vrot.lane.b32.xlu0 %v107_v4, %s137_s24  ;;  %37 = vrot.lane.b32.xlu1 %v108_v5, %s138_s25  ;;  %vm63_vm10 = vcmask 458112   ;;  %vm69_vm11 = vcmask 392512   ;;  %vm75_vm12 = vcmask 326912   ;;  %vm81_vm13 = vcmask 261312  }
   0xb   :  { %vm87_vm14 = vcmask 195712   ;;  %vm93_vm15 = vcmask 130112  }
   0xe   :  { %43 = vrot.lane.b32.xlu0 %v109_v7, %s139_s30  ;;  %49 = vrot.lane.b32.xlu1 %v110_v8, %s140_s2 }
  0x12   :  { %55 = vrot.lane.b32.xlu0 %v111_v9, %s141_s7  ;;  %61 = vrot.lane.b32.xlu1 %v112_v10, %s142_s8 }
  0x16   :  { %67 = vrot.lane.b32.xlu0 %v113_v11, %s143_s13  ;;  %73 = vrot.lane.b32.xlu1 %v114_v12, %s144_s14 }
  0x1a   :  { %79 = vrot.lane.b32.xlu0 %v115_v13, %s145_s19  ;;  %85 = vrot.lane.b32.xlu1 %v116_v14, %s146_s20 }
  0x1e   :  { %91 = vrot.lane.b32.xlu0 %v117_v15, %s147_s0 }
  0x74   :  { %v8_v16 = vpop.permute.xlu0 %7   ;;  %v20_v17 = vpop.permute.xlu1 %19  }
  0x75   :  { %10 = vst.msk [vmem:[#allocation0] sm:$0x1] %vm9_vm1, %v8_v16  }
  0x78   :  { %v14_v18 = vpop.permute.xlu0 %13   ;;  %v26_v19 = vpop.permute.xlu1 %25  }
  0x79   :  { %16 = vst.msk [vmem:[#allocation0] sm:$0x1] %vm15_vm2, %v14_v18  }
  0x7a   :  { %22 = vst.msk [vmem:[#allocation0] sm:$0x1] %vm21_vm3, %v20_v17  }
  0x7b   :  { %28 = vst.msk [vmem:[#allocation0] sm:$0x1] %vm27_vm4, %v26_v19  }
  0x7c   :  { %v32_v20 = vpop.permute.xlu0 %31   ;;  %v38_v21 = vpop.permute.xlu1 %37  }
  0x7d   :  { %34 = vst.msk [vmem:[#allocation0] sm:$0x1] %vm33_vm5, %v32_v20  }
  0x7e   :  { %40 = vst.msk [vmem:[#allocation0] sm:$0x1] %vm39_vm6, %v38_v21  }
  0x80   :  { %v44_v22 = vpop.permute.xlu0 %43   ;;  %v50_v23 = vpop.permute.xlu1 %49  }
  0x81   :  { %46 = vst.msk [vmem:[#allocation0] sm:$0x1] %vm45_vm7, %v44_v22  }
  0x82   :  { %52 = vst.msk [vmem:[#allocation0] sm:$0x1] %vm51_vm8, %v50_v23  }
  0x84   :  { %v56_v24 = vpop.permute.xlu0 %55   ;;  %v62_v25 = vpop.permute.xlu1 %61  }
  0x85   :  { %58 = vst.msk [vmem:[#allocation0] sm:$0x1] %vm57_vm9, %v56_v24  }
  0x86   :  { %64 = vst.msk [vmem:[#allocation0] sm:$0x1] %vm63_vm10, %v62_v25  }
  0x88   :  { %v68_v26 = vpop.permute.xlu0 %67   ;;  %v74_v27 = vpop.permute.xlu1 %73  }
  0x89   :  { %70 = vst.msk [vmem:[#allocation0] sm:$0x1] %vm69_vm11, %v68_v26  }
  0x8a   :  { %76 = vst.msk [vmem:[#allocation0] sm:$0x1] %vm75_vm12, %v74_v27  }
  0x8c   :  { %v80_v28 = vpop.permute.xlu0 %79   ;;  %v86_v29 = vpop.permute.xlu1 %85  }
  0x8d   :  { %82 = vst.msk [vmem:[#allocation0] sm:$0x1] %vm81_vm13, %v80_v28  }
  0x8e   :  { %88 = vst.msk [vmem:[#allocation0] sm:$0x1] %vm87_vm14, %v86_v29  }
  0x90   :  { %v92_v30 = vpop.permute.xlu0 %91  }
  0x91   :  { %94 = vst.msk [vmem:[#allocation0] sm:$0x1] %vm93_vm15, %v92_v30  }
  0x98   :  { %v99_v31 = vld [vmem:[#allocation0] sm:$0x1] }
  0x99   :  { %102 = vst [vmem:[%s210_s1] sm:$0x1] %v99_v31 }

// kernel: recurrent_block_forward.1
= control target key start
LH: loop header
LB: loop body
LE: loop exit
PB: predicated region body
PF: predicated region fallthrough
CT: control target
= control target key end

     0   :  { %s1259_s12 = smov 0   ;;  %s1732_s0 = inlined_call_operand.vmem [shape: f32[2,16,128], index: 0, kind: input, shape index: {}]   ;;  %s1733_s1 = inlined_call_operand.vmem [shape: f32[3,128,128], index: 1, kind: input, shape index: {}]   ;;  %s1734_s2 = inlined_call_operand.vmem [shape: f32[1,128], index: 2, kind: input, shape index: {}]   ;;  %s1735_s3 = inlined_call_operand.vmem [shape: f32[2,16,128], index: 3, kind: output, shape index: {}]  }
   0x1 LB: > { %s824_s13 = sadd.s32 4294967295, %s1236_s12   ;;  %p828_p0 = scmp.ge.s32.totalorder %s1236_s12, 1  ;;  %s1236_s12 = sphi %s1259_s12, %s13_s12  }
   0x2   : > { %p137_p1 = scmp.lt.s32.totalorder %s1236_s12, 3 }
   0x4   : > { %p138_p2 = pnand %p828_p0, %p137_p1 }
   0x5   : > { %p161_p3 = scmp.lt.s32.totalorder (!%p138_p2), %s824_s13, 1 }
   0x6   : > { %141 = sbr.rel (%p138_p2) target bundleno = 517 (0x205), region = 32 }
   0xb   : > { %v1270_v0 = vld [vmem:[%s1733_s1 + $0xf8] sm:$0xff]  ;;  %v1280_v2 = vld [vmem:[%s1733_s1 + $0xf0] sm:$0xff]  ;;  %v1238_v4 = vmov 0.0   ;;  %v1294_v5 = vld [vmem:[%s1733_s1 + $0xe8] sm:$0xff]  ;;  %s1737_s13 = smov (!%p161_p3, %s824_s13), 1 }
   0xc   : > { %v1275_v1 = vld [vmem:[%s1733_s1 + $0x78] sm:$0xff]  ;;  %1011 = vmatprep.subr.mxu0 %v1270_v0  ;;  %v1287_v3 = vld [vmem:[%s1733_s1 + $0x70] sm:$0xff]  ;;  %171 = vst [vmem:[#allocation2] sm:$0x1] %v1238_v4  ;;  %172 = vst [vmem:[#allocation2 + $0x11] sm:$0x1] %v1238_v4 }
   0xd   : > { %1046 = vmatprep.subr.mxu1 %v1275_v1  ;;  %1012 = vmatpush3.msra.mxu0 %v1270_v0  ;;  %v1299_v6 = vld [vmem:[%s1733_s1 + $0x68] sm:$0xff]  ;;  %v1310_v7 = vld [vmem:[%s1733_s1 + $0xe0] sm:$0xff]  ;;  %s901_s30 = sshll.u32 %s1737_s13, 4  ;;  %v1325_v9 = vld [vmem:[%s1733_s1 + $0xd8] sm:$0xff] }
   0xe   : > { %1047 = vmatpush3.msra.mxu1 %v1275_v1  ;;  %1013 = vmatprep.subr.mxu0 %v1280_v2  ;;  %v1315_v8 = vld [vmem:[%s1733_s1 + $0x60] sm:$0xff]  ;;  %v1330_v10 = vld [vmem:[%s1733_s1 + $0x58] sm:$0xff]  ;;  %s165_s10 = scalar_lea.vmem %s1732_s0, %s901_s30  ;;  %v1344_v11 = vld [vmem:[%s1733_s1 + $0xd0] sm:$0xff]  ;;  %s170_s21 = scalar_lea.vmem %s1735_s3, %s901_s30 }
   0xf   : > { %1048 = vmatprep.subr.mxu1 %v1287_v3  ;;  %1014 = vmatpush3.msra.mxu0 %v1280_v2  ;;  %v1349_v12 = vld [vmem:[%s1733_s1 + $0x50] sm:$0xff]  ;;  %v1358_v13 = vld [vmem:[%s1733_s1 + $0xc8] sm:$0xff]  ;;  %v1365_v15 = vld [vmem:[%s165_s10] sm:$0xff] }
  0x10   : > { %1049 = vmatpush3.msra.mxu1 %v1287_v3  ;;  %1015 = vmatprep.subr.mxu0 %v1294_v5  ;;  %v1363_v14 = vld [vmem:[%s1733_s1 + $0x48] sm:$0xff]  ;;  %175 = vst [vmem:[#allocation2 + $0x1] sm:$0xff] %v1365_v15  ;;  %v1377_v17 = vld [vmem:[%s1733_s1 + $0xc0] sm:$0xff]  ;;  %v1392_v19 = vld [vmem:[%s1733_s1 + $0xb8] sm:$0xff] }
  0x11   : > { %1050 = vmatprep.subr.mxu1 %v1299_v6  ;;  %1016 = vmatpush3.msra.mxu0 %v1294_v5  ;;  %v1370_v16 = vld [vmem:[%s165_s10 + $0x8] sm:$0xff]  ;;  %v1382_v18 = vld [vmem:[%s1733_s1 + $0x40] sm:$0xff]  ;;  %v1397_v20 = vld [vmem:[%s1733_s1 + $0x38] sm:$0xff] }
  0x12   : > { %1051 = vmatpush3.msra.mxu1 %v1299_v6  ;;  %1017 = vmatprep.subr.mxu0 %v1310_v7  ;;  %176 = vst [vmem:[#allocation2 + $0x9] sm:$0xff] %v1370_v16  ;;  %v1406_v21 = vld [vmem:[%s1733_s1 + $0xb0] sm:$0xff]  ;;  %v1420_v23 = vld [vmem:[%s1733_s1 + $0xa8] sm:$0xff]  ;;  %v1434_v25 = vld [vmem:[%s1733_s1 + $0xa0] sm:$0xff] }
  0x13   : > { %1052 = vmatprep.subr.mxu1 %v1315_v8  ;;  %1018 = vmatpush3.msra.mxu0 %v1310_v7  ;;  %v1411_v22 = vld [vmem:[%s1733_s1 + $0x30] sm:$0xff]  ;;  %v1425_v24 = vld [vmem:[%s1733_s1 + $0x28] sm:$0xff]  ;;  %v1439_v26 = vld [vmem:[%s1733_s1 + $0x20] sm:$0xff] }
  0x14   : > { %1053 = vmatpush3.msra.mxu1 %v1315_v8  ;;  %1019 = vmatprep.subr.mxu0 %v1325_v9  ;;  %v1448_v27 = vld [vmem:[%s1733_s1 + $0x98] sm:$0xff]  ;;  %v1462_v29 = vld [vmem:[%s1733_s1 + $0x90] sm:$0xff]  ;;  %v1476_v31 = vld [vmem:[%s1733_s1 + $0x88] sm:$0xff] }
  0x15   : > { %1054 = vmatprep.subr.mxu1 %v1330_v10  ;;  %1020 = vmatpush3.msra.mxu0 %v1325_v9  ;;  %v1453_v28 = vld [vmem:[%s1733_s1 + $0x18] sm:$0xff]  ;;  %v1467_v30 = vld [vmem:[%s1733_s1 + $0x10] sm:$0xff]  ;;  %v1481_v32 = vld [vmem:[%s1733_s1 + $0x8] sm:$0xff] }
  0x16   : > { %1055 = vmatpush3.msra.mxu1 %v1330_v10  ;;  %1021 = vmatprep.subr.mxu0 %v1344_v11  ;;  %v1490_v33 = vld [vmem:[%s1733_s1 + $0x80] sm:$0xff]  ;;  %v1508_v37 = vld [vmem:[%s1733_s1 + $0x178] sm:$0xff]  ;;  %v1515_v39 = vld [vmem:[%s1733_s1 + $0x170] sm:$0xff] }
  0x17   : > { %1056 = vmatprep.subr.mxu1 %v1349_v12  ;;  %1022 = vmatpush3.msra.mxu0 %v1344_v11  ;;  %v1495_v34 = vld [vmem:[%s1733_s1] sm:$0xff]  ;;  %v1522_v40 = vld [vmem:[%s1733_s1 + $0x168] sm:$0xff]  ;;  %v1540_v42 = vld [vmem:[%s1733_s1 + $0x158] sm:$0xff] }
  0x18   : > { %1057 = vmatpush3.msra.mxu1 %v1349_v12  ;;  %1023 = vmatprep.subr.mxu0 %v1358_v13  ;;  %v177_v35 = vld [vmem:[#allocation2] sm:$0xff]  ;;  %v1549_v43 = vld [vmem:[%s1733_s1 + $0x150] sm:$0xff]  ;;  %v1558_v44 = vld [vmem:[%s1733_s1 + $0x148] sm:$0xff] }
  0x19   : > { %1058 = vmatprep.subr.mxu1 %v1363_v14  ;;  %1024 = vmatpush3.msra.mxu0 %v1358_v13  ;;  %v178_v36 = vld [vmem:[#allocation2 + $0x8] sm:$0xff]  ;;  %v1531_v41 = vld [vmem:[%s1733_s1 + $0x160] sm:$0xff]  ;;  %v1576_v46 = vld [vmem:[%s1733_s1 + $0x138] sm:$0xff] }
  0x1a   : > { %1059 = vmatpush3.msra.mxu1 %v1363_v14  ;;  %1025 = vmatprep.subr.mxu0 %v1377_v17  ;;  %v364_v38 = vld [vmem:[#allocation2 + $0x2] sm:$0xff]  ;;  %v1585_v47 = vld [vmem:[%s1733_s1 + $0x130] sm:$0xff]  ;;  %v1612_v50 = vld [vmem:[%s1733_s1 + $0x118] sm:$0xff] }
  0x1b   : > { %1060 = vmatprep.subr.mxu1 %v1382_v18  ;;  %1026 = vmatpush3.msra.mxu0 %v1377_v17  ;;  %v1567_v45 = vld [vmem:[%s1733_s1 + $0x140] sm:$0xff]  ;;  %v1594_v48 = vld [vmem:[%s1733_s1 + $0x128] sm:$0xff]  ;;  %v1621_v51 = vld [vmem:[%s1733_s1 + $0x110] sm:$0xff] }
  0x1c   : > { %1061 = vmatpush3.msra.mxu1 %v1382_v18  ;;  %1027 = vmatprep.subr.mxu0 %v1392_v19  ;;  %v1603_v49 = vld [vmem:[%s1733_s1 + $0x120] sm:$0xff]  ;;  %v1630_v52 = vld [vmem:[%s1733_s1 + $0x108] sm:$0xff] }
  0x1d   : > { %1062 = vmatprep.subr.mxu1 %v1397_v20  ;;  %1028 = vmatpush3.msra.mxu0 %v1392_v19  ;;  %v1639_v53 = vld [vmem:[%s1733_s1 + $0x100] sm:$0xff]  ;;  %v365_v54 = vld [vmem:[#allocation2 + $0xa] sm:$0xff] }
  0x1e   : > { %1063 = vmatpush3.msra.mxu1 %v1397_v20  ;;  %1029 = vmatprep.subr.mxu0 %v1406_v21  ;;  %v1687_v61 = vld [vmem:[%s1734_s2] ss:$0 sm:$0xff] }
  0x1f   : > { %1064 = vmatprep.subr.mxu1 %v1411_v22  ;;  %1030 = vmatpush3.msra.mxu0 %v1406_v21 }
  0x20   : > { %1065 = vmatpush3.msra.mxu1 %v1411_v22  ;;  %1031 = vmatprep.subr.mxu0 %v1420_v23 }
  0x21   : > { %1066 = vmatprep.subr.mxu1 %v1425_v24  ;;  %1032 = vmatpush3.msra.mxu0 %v1420_v23 }
  0x22   : > { %1067 = vmatpush3.msra.mxu1 %v1425_v24  ;;  %1033 = vmatprep.subr.mxu0 %v1434_v25 }
  0x23   : > { %1068 = vmatprep.subr.mxu1 %v1439_v26  ;;  %1034 = vmatpush3.msra.mxu0 %v1434_v25 }
  0x24   : > { %1069 = vmatpush3.msra.mxu1 %v1439_v26  ;;  %1035 = vmatprep.subr.mxu0 %v1448_v27 }
  0x25   : > { %1070 = vmatprep.subr.mxu1 %v1453_v28  ;;  %1036 = vmatpush3.msra.mxu0 %v1448_v27 }
  0x26   : > { %1071 = vmatpush3.msra.mxu1 %v1453_v28  ;;  %1037 = vmatprep.subr.mxu0 %v1462_v29 }
  0x27   : > { %1072 = vmatprep.subr.mxu1 %v1467_v30  ;;  %1038 = vmatpush3.msra.mxu0 %v1462_v29 }
  0x28   : > { %1073 = vmatpush3.msra.mxu1 %v1467_v30  ;;  %1039 = vmatprep.subr.mxu0 %v1476_v31 }
  0x29   : > { %1074 = vmatprep.subr.mxu1 %v1481_v32  ;;  %1040 = vmatpush3.msra.mxu0 %v1476_v31 }
  0x2a   : > { %1075 = vmatpush3.msra.mxu1 %v1481_v32  ;;  %1041 = vmatprep.subr.mxu0 %v1490_v33 }
  0x2b   : > { %1076 = vmatprep.subr.mxu1 %v1495_v34  ;;  %1042 = vmatpush3.msra.mxu0 %v1490_v33 }
  0x2c   : > { %1043 = vmatprep.mubr.f32.mxu0 %v1365_v15  ;;  %1077 = vmatpush3.msra.mxu1 %v1495_v34 }
  0x2d   : > { %1078 = vmatprep.mubr.f32.mxu1 %v177_v35  ;;  %1044 = vmatmul.mubr.f32.vlgmr.msra.gmra.mxu0 %v1370_v16 }
  0x2e   : > { %1079 = vmatmul.mubr.f32.vlgmr.msra.gmra.mxu1 %v178_v36  ;;  %1081 = vmatprep.subr.mxu0 %v1508_v37 }
  0x2f   : > { %1113 = vmatprep.mubr.f32.mxu0 %v364_v38  ;;  %1082 = vmatpush3.msra.mxu0 %v1508_v37 }
  0x30   : > { %1116 = vmatprep.subr.mxu1 %v1270_v0  ;;  %1083 = vmatprep.subr.mxu0 %v1515_v39 }
  0x31   : > { %1117 = vmatpush3.msra.mxu1 %v1270_v0  ;;  %1084 = vmatpush3.msra.mxu0 %v1515_v39 }
  0x32   : > { %1118 = vmatprep.subr.mxu1 %v1280_v2  ;;  %1085 = vmatprep.subr.mxu0 %v1522_v40 }
  0x33   : > { %1119 = vmatpush3.msra.mxu1 %v1280_v2  ;;  %1086 = vmatpush3.msra.mxu0 %v1522_v40 }
  0x34   : > { %1120 = vmatprep.subr.mxu1 %v1294_v5  ;;  %1087 = vmatprep.subr.mxu0 %v1531_v41 }
  0x35   : > { %1121 = vmatpush3.msra.mxu1 %v1294_v5  ;;  %1088 = vmatpush3.msra.mxu0 %v1531_v41 }
  0x36   : > { %1122 = vmatprep.subr.mxu1 %v1310_v7  ;;  %1089 = vmatprep.subr.mxu0 %v1540_v42 }
  0x37   : > { %1123 = vmatpush3.msra.mxu1 %v1310_v7  ;;  %1090 = vmatpush3.msra.mxu0 %v1540_v42 }
  0x38   : > { %1124 = vmatprep.subr.mxu1 %v1325_v9  ;;  %1091 = vmatprep.subr.mxu0 %v1549_v43 }
  0x39   : > { %1125 = vmatpush3.msra.mxu1 %v1325_v9  ;;  %1092 = vmatpush3.msra.mxu0 %v1549_v43 }
  0x3a   : > { %1126 = vmatprep.subr.mxu1 %v1344_v11  ;;  %1093 = vmatprep.subr.mxu0 %v1558_v44 }
  0x3b   : > { %1127 = vmatpush3.msra.mxu1 %v1344_v11  ;;  %1094 = vmatpush3.msra.mxu0 %v1558_v44 }
  0x3c   : > { %1128 = vmatprep.subr.mxu1 %v1358_v13  ;;  %1095 = vmatprep.subr.mxu0 %v1567_v45 }
  0x3d   : > { %1129 = vmatpush3.msra.mxu1 %v1358_v13  ;;  %1096 = vmatpush3.msra.mxu0 %v1567_v45 }
  0x3e   : > { %1130 = vmatprep.subr.mxu1 %v1377_v17  ;;  %1097 = vmatprep.subr.mxu0 %v1576_v46 }
  0x3f   : > { %1131 = vmatpush3.msra.mxu1 %v1377_v17  ;;  %1098 = vmatpush3.msra.mxu0 %v1576_v46 }
  0x40   : > { %1132 = vmatprep.subr.mxu1 %v1392_v19  ;;  %1099 = vmatprep.subr.mxu0 %v1585_v47 }
  0x41   : > { %1133 = vmatpush3.msra.mxu1 %v1392_v19  ;;  %1100 = vmatpush3.msra.mxu0 %v1585_v47 }
  0x42   : > { %1134 = vmatprep.subr.mxu1 %v1406_v21  ;;  %1101 = vmatprep.subr.mxu0 %v1594_v48 }
  0x43   : > { %1135 = vmatpush3.msra.mxu1 %v1406_v21  ;;  %1102 = vmatpush3.msra.mxu0 %v1594_v48 }
  0x44   : > { %1136 = vmatprep.subr.mxu1 %v1420_v23  ;;  %1103 = vmatprep.subr.mxu0 %v1603_v49 }
  0x45   : > { %1137 = vmatpush3.msra.mxu1 %v1420_v23  ;;  %1104 = vmatpush3.msra.mxu0 %v1603_v49 }
  0x46   : > { %1138 = vmatprep.subr.mxu1 %v1434_v25  ;;  %1105 = vmatprep.subr.mxu0 %v1612_v50 }
  0x47   : > { %1139 = vmatpush3.msra.mxu1 %v1434_v25  ;;  %1106 = vmatpush3.msra.mxu0 %v1612_v50 }
  0x48   : > { %1140 = vmatprep.subr.mxu1 %v1448_v27  ;;  %1107 = vmatprep.subr.mxu0 %v1621_v51 }
  0x49   : > { %1141 = vmatpush3.msra.mxu1 %v1448_v27  ;;  %1108 = vmatpush3.msra.mxu0 %v1621_v51 }
  0x4a   : > { %1142 = vmatprep.subr.mxu1 %v1462_v29  ;;  %1109 = vmatprep.subr.mxu0 %v1630_v52 }
  0x4b   : > { %1143 = vmatpush3.msra.mxu1 %v1462_v29  ;;  %1110 = vmatpush3.msra.mxu0 %v1630_v52 }
  0x4c   : > { %1144 = vmatprep.subr.mxu1 %v1476_v31  ;;  %1111 = vmatprep.subr.mxu0 %v1639_v53 }
  0x4d   : > { %1145 = vmatpush3.msra.mxu1 %v1476_v31  ;;  %1112 = vmatpush3.msra.mxu0 %v1639_v53 }
  0x4e   : > { %1146 = vmatprep.subr.mxu1 %v1490_v33  ;;  %1114 = vmatmul.mubr.f32.vlgmr.msra.gmra.mxu0 %v365_v54 }
  0x4f   : > { %1151 = vmatprep.subr.mxu0 %v1275_v1  ;;  %1147 = vmatpush3.msra.mxu1 %v1490_v33 }
  0x50   : > { %1152 = vmatpush3.msra.mxu0 %v1275_v1  ;;  %1186 = vmatprep.subr.mxu1 %v1508_v37 }
  0x51   : > { %1153 = vmatprep.subr.mxu0 %v1287_v3 }
  0x52   : > { %1154 = vmatpush3.msra.mxu0 %v1287_v3 }
  0x53   : > { %1155 = vmatprep.subr.mxu0 %v1299_v6 }
  0x54   : > { %1156 = vmatpush3.msra.mxu0 %v1299_v6 }
  0x55   : > { %1157 = vmatprep.subr.mxu0 %v1315_v8 }
  0x56   : > { %1158 = vmatpush3.msra.mxu0 %v1315_v8 }
  0x57   : > { %1159 = vmatprep.subr.mxu0 %v1330_v10 }
  0x58   : > { %1160 = vmatpush3.msra.mxu0 %v1330_v10 }
  0x59   : > { %1161 = vmatprep.subr.mxu0 %v1349_v12 }
  0x5a   : > { %1162 = vmatpush3.msra.mxu0 %v1349_v12 }
  0x5b   : > { %1163 = vmatprep.subr.mxu0 %v1363_v14 }
  0x5c   : > { %1164 = vmatpush3.msra.mxu0 %v1363_v14 }
  0x5d   : > { %1165 = vmatprep.subr.mxu0 %v1382_v18 }
  0x5e   : > { %1166 = vmatpush3.msra.mxu0 %v1382_v18 }
  0x5f   : > { %1167 = vmatprep.subr.mxu0 %v1397_v20 }
  0x60   : > { %1168 = vmatpush3.msra.mxu0 %v1397_v20 }
  0x61   : > { %1169 = vmatprep.subr.mxu0 %v1411_v22 }
  0x62   : > { %1170 = vmatpush3.msra.mxu0 %v1411_v22 }
  0x63   : > { %1171 = vmatprep.subr.mxu0 %v1425_v24 }
  0x64   : > { %1172 = vmatpush3.msra.mxu0 %v1425_v24 }
  0x65   : > { %1173 = vmatprep.subr.mxu0 %v1439_v26 }
  0x66   : > { %1174 = vmatpush3.msra.mxu0 %v1439_v26 }
  0x67   : > { %1175 = vmatprep.subr.mxu0 %v1453_v28 }
  0x68   : > { %1176 = vmatpush3.msra.mxu0 %v1453_v28 }
  0x69   : > { %1177 = vmatprep.subr.mxu0 %v1467_v30 }
  0x6a   : > { %1178 = vmatpush3.msra.mxu0 %v1467_v30 }
  0x6b   : > { %1179 = vmatprep.subr.mxu0 %v1481_v32 }
  0x6c   : > { %1180 = vmatpush3.msra.mxu0 %v1481_v32 }
  0x6d   : > { %1181 = vmatprep.subr.mxu0 %v1495_v34 }
  0x6e   : > { %1182 = vmatpush3.msra.mxu0 %v1495_v34 }
  0xed   : > { %v1045_v55 = vpop.f32.mrf.mxu0 }
  0xee   : > { %v1080_v56 = vpop.f32.mrf.mxu1 }
  0xef   : > { %v280_v57 = vpop.f32.mrf.mxu0  ;;  %v361_v59 = vadd.f32 %v1080_v56, %v1045_v55 }
  0xf0   : > { %v355_v58 = vpop.f32.mrf.mxu1 }
  0xf1   : > { %v356_v62 = vadd.f32 %v355_v58, %v280_v57 }
 0x10e   : > { %v1115_v60 = vpop.f32.mrf.mxu0 }
 0x10f   : > { %v459_v63 = vadd.f32 %v1115_v60, %v361_v59 }
 0x110   : > { %v449_v0 = vpop.f32.mrf.mxu0 }
 0x111   : > { %v468_v1 = vadd.f32 %v1687_v61, %v459_v63  ;;  %v458_v2 = vadd.f32 %v449_v0, %v356_v62 }
 0x113   : > { %v470_v3 = vmax.f32 %v468_v1, 0.0  ;;  %v467_v4 = vadd.f32 %v1687_v61, %v458_v2 }
 0x115   : > { %472 = vst [vmem:[#allocation2 + $0x9] sm:$0xff] %v470_v3  ;;  %v469_v5 = vmax.f32 %v467_v4, 0.0 }
 0x117   : > { %471 = vst [vmem:[#allocation2 + $0x1] sm:$0xff] %v469_v5  ;;  %1148 = vmatprep.mubr.f32.mxu1 %v469_v5 }
 0x118   : > { %1149 = vmatmul.mubr.f32.vlgmr.msra.gmra.mxu1 %v470_v3 }
 0x119   : > { %1187 = vmatpush3.msra.mxu1 %v1508_v37 }
 0x11a   : > { %1188 = vmatprep.subr.mxu1 %v1515_v39 }
 0x11b   : > { %1189 = vmatpush3.msra.mxu1 %v1515_v39 }
 0x11c   : > { %1190 = vmatprep.subr.mxu1 %v1522_v40  ;;  %v660_v9 = vld [vmem:[#allocation2 + $0xa] sm:$0xff] }
 0x11d   : > { %1191 = vmatpush3.msra.mxu1 %v1522_v40 }
 0x11e   : > { %v473_v6 = vld [vmem:[#allocation2] sm:$0xff]  ;;  %v474_v7 = vld [vmem:[#allocation2 + $0x8] sm:$0xff]  ;;  %1192 = vmatprep.subr.mxu1 %v1531_v41 }
 0x11f   : > { %v659_v8 = vld [vmem:[#allocation2 + $0x2] sm:$0xff]  ;;  %1183 = vmatprep.mubr.f32.mxu0 %v473_v6  ;;  %1193 = vmatpush3.msra.mxu1 %v1531_v41 }
 0x120   : > { %1218 = vmatprep.mubr.f32.mxu1 %v659_v8  ;;  %1184 = vmatmul.mubr.f32.vlgmr.msra.gmra.mxu0 %v474_v7 }
 0x121   : > { %1194 = vmatprep.subr.mxu1 %v1540_v42 }
 0x122   : > { %1195 = vmatpush3.msra.mxu1 %v1540_v42 }
 0x123   : > { %1196 = vmatprep.subr.mxu1 %v1549_v43 }
 0x124   : > { %1197 = vmatpush3.msra.mxu1 %v1549_v43 }
 0x125   : > { %1198 = vmatprep.subr.mxu1 %v1558_v44 }
 0x126   : > { %1199 = vmatpush3.msra.mxu1 %v1558_v44 }
 0x127   : > { %1200 = vmatprep.subr.mxu1 %v1567_v45 }
 0x128   : > { %1201 = vmatpush3.msra.mxu1 %v1567_v45 }
 0x129   : > { %1202 = vmatprep.subr.mxu1 %v1576_v46 }
 0x12a   : > { %1203 = vmatpush3.msra.mxu1 %v1576_v46 }
 0x12b   : > { %1204 = vmatprep.subr.mxu1 %v1585_v47 }
 0x12c   : > { %1205 = vmatpush3.msra.mxu1 %v1585_v47 }
 0x12d   : > { %1206 = vmatprep.subr.mxu1 %v1594_v48 }
 0x12e   : > { %1207 = vmatpush3.msra.mxu1 %v1594_v48 }
 0x12f   : > { %1208 = vmatprep.subr.mxu1 %v1603_v49 }
 0x130   : > { %1209 = vmatpush3.msra.mxu1 %v1603_v49 }
 0x131   : > { %1210 = vmatprep.subr.mxu1 %v1612_v50 }
 0x132   : > { %1211 = vmatpush3.msra.mxu1 %v1612_v50 }
 0x133   : > { %1212 = vmatprep.subr.mxu1 %v1621_v51 }
 0x134   : > { %1213 = vmatpush3.msra.mxu1 %v1621_v51 }
 0x135   : > { %1214 = vmatprep.subr.mxu1 %v1630_v52 }
 0x136   : > { %1215 = vmatpush3.msra.mxu1 %v1630_v52 }
 0x137   : > { %1216 = vmatprep.subr.mxu1 %v1639_v53 }
 0x138   : > { %1217 = vmatpush3.msra.mxu1 %v1639_v53 }
 0x139   : > { %1219 = vmatmul.mubr.f32.vlgmr.msra.gmra.mxu1 %v660_v9 }
 0x1d8   : > { %v1150_v10 = vpop.f32.mrf.mxu1 }
 0x1da   : > { %v575_v12 = vpop.f32.mrf.mxu1 }
 0x1e0   : > { %v1185_v11 = vpop.f32.mrf.mxu0 }
 0x1e1   : > { %v656_v14 = vadd.f32 %v1185_v11, %v1150_v10 }
 0x1e2   : > { %v650_v13 = vpop.f32.mrf.mxu0 }
 0x1e3   : > { %v651_v16 = vadd.f32 %v650_v13, %v575_v12 }
 0x1f9   : > { %v1220_v15 = vpop.f32.mrf.mxu1 }
 0x1fa   : > { %v753_v17 = vadd.f32 %v1220_v15, %v656_v14 }
 0x1fb   : > { %v743_v18 = vpop.f32.mrf.mxu1 }
 0x1fc   : > { %v755_v19 = vmul.f32 2.0, %v753_v17  ;;  %v752_v20 = vadd.f32 %v743_v18, %v651_v16 }
 0x1fe   : > { %v764_v21 = vadd.f32 %v1687_v61, %v755_v19  ;;  %v754_v22 = vmul.f32 2.0, %v752_v20 }
 0x200   : > { %v766_v23 = vmax.f32 %v764_v21, 0.0  ;;  %v763_v24 = vadd.f32 %v1687_v61, %v754_v22 }
 0x202   : > { %768 = vst [vmem:[%s170_s21 + $0x8] sm:$0xff] %v766_v23  ;;  %v765_v25 = vmax.f32 %v763_v24, 0.0 }
 0x204   : > { %767 = vst [vmem:[%s170_s21] sm:$0xff] %v765_v25 }
 0x205 PF: > { %s13_s12 = sadd.s32 1, %s1236_s12  }
 0x206   : > { %p10_p4 = scmp.ge.s32.totalorder %s13_s12, 4  }
 0x208   :  { %12 = sbr.rel (!%p10_p4) target bundleno = 1 (0x1), region = 64 }

</bundles_post_ra>
